<compile_context>
chip_gen: v6e
topology: v6e:2x2x1
jax: 0.10.0
libtpu: 0.0.40
codegen_flags: <defaults>
</compile_context>

<pallas_src>
import functools

import jax
import jax.numpy as jnp
from jax.experimental import pallas as pl
from jax.experimental.pallas import tpu as pltpu

BN_EPS = 1e-5


# ----------------------------------------------------------------------------
# Fused ResidualBlock kernel
# ----------------------------------------------------------------------------
def _make_block_kernel(TB, L, cin_p, cout_p, project):
    """conv1+BN1+ReLU -> conv2+BN2+ReLU -> (+shortcut), one fused kernel body."""
    K = 3
    M = TB * L

    def conv3(pad, w_ref, C):
        # pad: (TB, L+4, C) bf16 scratch.  Input row l lives at scratch row l+2,
        # zero halo rows at 1 and L+2.  Tap k reads scratch rows [1+k : 1+k+L].
        if C < 256:
            # Small channels: single im2col matmul -> 3x larger MXU contraction.
            cols = jnp.concatenate(
                [pad[:, 1 + k:1 + k + L, :] for k in range(K)], axis=-1)
            return jnp.dot(cols.reshape(M, K * C), w_ref[...],
                           preferred_element_type=jnp.float32)
        # Large channels: 3 per-tap matmuls, no (M, 3C) im2col buffer.
        acc = jnp.dot(pad[:, 1:1 + L, :].reshape(M, C), w_ref[0:C, :],
                      preferred_element_type=jnp.float32)
        for k in range(1, K):
            acc = acc + jnp.dot(pad[:, 1 + k:1 + k + L, :].reshape(M, C),
                                w_ref[k * C:(k + 1) * C, :],
                                preferred_element_type=jnp.float32)
        return acc

    def kernel(x_ref, w1_ref, b1_ref, w2_ref, b2_ref, *rest):
        if project:
            wr_ref, br_ref, o_ref, xpad, hpad = rest
        else:
            o_ref, xpad, hpad = rest

        x = x_ref[...]                                  # (TB, L, cin_p) f32
        xb = x.astype(jnp.bfloat16)

        # ---- conv1 (k=3, pad=1) + folded BN1 + ReLU --------------------------
        # Zero only the halo rows (aligned 2-row stores), not the whole scratch.
        xpad[:, 0:2, :] = jnp.zeros((TB, 2, cin_p), jnp.bfloat16)
        xpad[:, L + 2:L + 4, :] = jnp.zeros((TB, 2, cin_p), jnp.bfloat16)
        xpad[:, 2:2 + L, :] = xb
        h = jnp.maximum(conv3(xpad, w1_ref, cin_p) + b1_ref[...], 0.0)

        # ---- conv2 (k=3, pad=1) + folded BN2 + ReLU --------------------------
        # conv1's epilogue result goes straight into hpad's interior.
        hpad[:, 0:2, :] = jnp.zeros((TB, 2, cout_p), jnp.bfloat16)
        hpad[:, L + 2:L + 4, :] = jnp.zeros((TB, 2, cout_p), jnp.bfloat16)
        hpad[:, 2:2 + L, :] = h.reshape(TB, L, cout_p).astype(jnp.bfloat16)
        y = jnp.maximum(conv3(hpad, w2_ref, cout_p) + b2_ref[...], 0.0)

        # ---- shortcut + residual add (no ReLU after the add, per the spec) ----
        if project:
            res = jnp.dot(xb.reshape(M, cin_p), wr_ref[...],
                          preferred_element_type=jnp.float32) + br_ref[...]
        else:
            res = x.reshape(M, cout_p)                  # cin_p == cout_p

        o_ref[...] = (y + res).reshape(TB, L, cout_p).astype(o_ref.dtype)

    return kernel


# ----------------------------------------------------------------------------
# Tile-size / VMEM budgeting helpers
# ----------------------------------------------------------------------------
def _tile_vmem_bytes(tb, L, cin_p, cout_p):
    m = tb * L
    c_big = max(cin_p, cout_p)
    b = 0
    b += 2 * tb * L * cin_p * 4                 # x block, double-buffered (f32)
    b += 2 * tb * L * cout_p * 4                # out block, double-buffered
    b += tb * (L + 4) * (cin_p + cout_p) * 2    # bf16 padded halo scratches
    b += m * 3 * c_big * 2                      # im2col operand (worst case)
    b += 3 * m * cout_p * 4                     # f32 acc / h / y temporaries
    return b


def _weight_vmem_bytes(cin_p, cout_p, project):
    b = (3 * cin_p + 3 * cout_p + (cin_p if project else 0)) * cout_p * 2
    b += 3 * cout_p * 4
    return 2 * b                                # conservative: double-buffered


def _pick_tb(B, L, cin_p, cout_p, budget=20 * 1024 * 1024, m_target=256):
    """Largest divisor of B fitting the per-tile budget, stopping once the
    matmul M dim (tb*L) reaches m_target (keeps MXU fed without over-allocating,
    and keeps tiles small enough for v7x's 64 MiB VMEM)."""
    tb = 1
    for cand in range(1, B + 1):
        if B % cand:
            continue
        if cand > 1 and _tile_vmem_bytes(cand, L, cin_p, cout_p) > budget:
            break
        tb = cand
        if cand * L >= m_target:
            break
    return tb


# ----------------------------------------------------------------------------
# Pallas wrappers
# ----------------------------------------------------------------------------
def residual_block_nlc(x_cl, fp, out_dtype=jnp.float32):
    """Channels-last, channel-padded path (preferred end-to-end layout).

    x_cl: (B, L, cin_pad) float32, channel-padded to the folded params.
    Returns (B, L, cout_pad) in `out_dtype` (use bf16 when the next block
    consumes bf16 operands to halve HBM writeback).
    """
    B, L, cin_p = x_cl.shape
    cout_p = fp["w1"].shape[1]
    assert fp["w1"].shape[0] == 3 * cin_p, "x channels do not match folded params"
    project = "wr" in fp
    if not project:
        assert cin_p == cout_p

    TB = _pick_tb(B, L, cin_p, cout_p)
    grid = (B // TB,)

    args = [x_cl, fp["w1"], fp["b1"], fp["w2"], fp["b2"]]
    in_specs = [
        # streamed activation tile  (TODO(synk): if xprof shows exposed DMA here,
        # add pipeline_mode=pl.Buffered(3) on this spec only)
        pl.BlockSpec((TB, L, cin_p), lambda i: (i, 0, 0)),
        # weights/biases: constant index_map -> stay resident across grid steps
        pl.BlockSpec((3 * cin_p, cout_p), lambda i: (0, 0)),
        pl.BlockSpec((1, cout_p), lambda i: (0, 0)),
        pl.BlockSpec((3 * cout_p, cout_p), lambda i: (0, 0)),
        pl.BlockSpec((1, cout_p), lambda i: (0, 0)),
    ]
    if project:
        args += [fp["wr"], fp["br"]]
        in_specs += [
            pl.BlockSpec((cin_p, cout_p), lambda i: (0, 0)),
            pl.BlockSpec((1, cout_p), lambda i: (0, 0)),
        ]

    est = _tile_vmem_bytes(TB, L, cin_p, cout_p) + _weight_vmem_bytes(
        cin_p, cout_p, project)
    vmem_limit = int(min(64 * 1024 * 1024, max(32 * 1024 * 1024, est * 1.4)))

    return pl.pallas_call(
        _make_block_kernel(TB, L, cin_p, cout_p, project),
        out_shape=jax.ShapeDtypeStruct((B, L, cout_p), out_dtype),
        grid=grid,
        in_specs=in_specs,
        out_specs=pl.BlockSpec((TB, L, cout_p), lambda i: (i, 0, 0)),
        scratch_shapes=[
            pltpu.VMEM((TB, L + 4, cin_p), jnp.bfloat16),   # padded input halo buf
            pltpu.VMEM((TB, L + 4, cout_p), jnp.bfloat16),  # padded hidden halo buf
        ],
        compiler_params=pltpu.CompilerParams(
            dimension_semantics=("parallel",),
            vmem_limit_bytes=vmem_limit,
        ),
    )(*args)


@functools.partial(jax.jit, static_argnames=("cin", "cout", "out_dtype"))
def residual_block(x_ncl, fp, *, cin, cout, out_dtype=jnp.float32):
    """PyTorch-layout convenience entry: x (B, Cin, L) -> (B, Cout, L).

    NOTE: in a full network, keep activations channels-last + channel-padded
    end-to-end and call residual_block_nlc directly; the transpose/pad/slice
    here are entry/exit-only costs for parity with the PyTorch layout.
    """
    cin_p = fp["w1"].shape[0] // 3
    x_cl = jnp.transpose(x_ncl, (0, 2, 1)).astype(jnp.float32)
    if cin_p != cin:
        x_cl = jnp.pad(x_cl, ((0, 0), (0, 0), (0, cin_p - cin)))
    y = residual_block_nlc(x_cl, fp, out_dtype)
    return jnp.transpose(y[..., :cout], (0, 2, 1))


# ----------------------------------------------------------------------------
# Parameters: PyTorch-style raw params + BN folding (with channel padding)
# ----------------------------------------------------------------------------
def _init_conv(key, cin, cout, k):
    k1, k2 = jax.random.split(key)
    bound = 1.0 / (cin * k) ** 0.5
    w = jax.random.uniform(k1, (cout, cin, k), jnp.float32, -bound, bound)
    b = jax.random.uniform(k2, (cout,), jnp.float32, -bound, bound)
    return w, b


def _init_bn(key, c):
    k1, k2, k3, k4 = jax.random.split(key, 4)
    gamma = jax.random.uniform(k1, (c,), jnp.float32, 0.5, 1.5)
    beta = jax.random.uniform(k2, (c,), jnp.float32, -0.2, 0.2)
    mean = jax.random.uniform(k3, (c,), jnp.float32, -0.2, 0.2)
    var = jax.random.uniform(k4, (c,), jnp.float32, 0.5, 1.5)
    return gamma, beta, mean, var


def init_residual_block_params(key, cin, cout):
    keys = jax.random.split(key, 6)
    p = {
        "conv1": _init_conv(keys[0], cin, cout, 3),
        "bn1": _init_bn(keys[1], cout),
        "conv2": _init_conv(keys[2], cout, cout, 3),
        "bn2": _init_bn(keys[3], cout),
    }
    if cin != cout:
        p["convr"] = _init_conv(keys[4], cin, cout, 1)
        p["bnr"] = _init_bn(keys[5], cout)
    return p


def _round_up(n, m):
    return n if m is None else ((n + m - 1) // m) * m


def _fold_conv_bn(conv, bn, cin_pad, cout_pad):
    """Fold eval-mode BN into the conv and pad channels.
    Returns ((K*cin_pad, cout_pad) bf16 im2col weight, (1, cout_pad) f32 bias)."""
    w, b = conv                                   # w: (Cout, Cin, K)
    gamma, beta, mean, var = bn
    scale = gamma / jnp.sqrt(var + BN_EPS)        # (Cout,)
    w_cl = jnp.transpose(w, (2, 1, 0)) * scale    # (K, Cin, Cout), scale folded in
    K, cin, cout = w_cl.shape
    w_p = jnp.zeros((K, cin_pad, cout_pad), jnp.float32).at[:, :cin, :cout].set(w_cl)
    b_f = scale * (b - mean) + beta
    b_p = jnp.zeros((1, cout_pad), jnp.float32).at[0, :cout].set(b_f)
    return w_p.reshape(K * cin_pad, cout_pad).astype(jnp.bfloat16), b_p


def fold_block_params(p, pad_to=128):
    """Fold BN into conv weights and pad channel dims to a multiple of `pad_to`
    (128 -> lane-dense stores, full MXU columns on v6e/v7x)."""
    cout, cin, _ = p["conv1"][0].shape
    cin_p, cout_p = _round_up(cin, pad_to), _round_up(cout, pad_to)
    fp = {}
    fp["w1"], fp["b1"] = _fold_conv_bn(p["conv1"], p["bn1"], cin_p, cout_p)
    fp["w2"], fp["b2"] = _fold_conv_bn(p["conv2"], p["bn2"], cout_p, cout_p)
    if "convr" in p:
        fp["wr"], fp["br"] = _fold_conv_bn(p["convr"], p["bnr"], cin_p, cout_p)
    return fp


# ----------------------------------------------------------------------------
# Pure-JAX float32 reference (mirrors the PyTorch module with eval-mode BN)
# ----------------------------------------------------------------------------
def _conv1d_ref(x, w, b, pad):
    y = jax.lax.conv_general_dilated(
        x, w, window_strides=(1,), padding=[(pad, pad)],
        dimension_numbers=("NCH", "OIH", "NCH"))
    return y + b[None, :, None]


def _bn_ref(x, bn):
    gamma, beta, mean, var = bn
    inv = gamma / jnp.sqrt(var + BN_EPS)
    return (x - mean[None, :, None]) * inv[None, :, None] + beta[None, :, None]


def residual_block_ref(x, p):
    h = jax.nn.relu(_bn_ref(_conv1d_ref(x, *p["conv1"], pad=1), p["bn1"]))
    y = jax.nn.relu(_bn_ref(_conv1d_ref(h, *p["conv2"], pad=1), p["bn2"]))
    if "convr" in p:
        res = _bn_ref(_conv1d_ref(x, *p["convr"], pad=0), p["bnr"])
    else:
        res = x
    return y + res


# ----------------------------------------------------------------------------
def _run_case(key_params, key_x, B, L, cin, cout):
    p = init_residual_block_params(key_params, cin, cout)
    fp = fold_block_params(p)
    x = jax.random.normal(key_x, (B, cin, L), jnp.float32)
    out = jax.block_until_ready(residual_block(x, fp, cin=cin, cout=cout))
    ref = residual_block_ref(x, p)
    assert out.shape == (B, cout, L), out.shape
    assert bool(jnp.all(jnp.isfinite(out)))
    # bf16 matmul operands with f32 accumulation -> loose-ish tolerance vs f32 ref.
    assert bool(jnp.allclose(out, ref, rtol=5e-2, atol=5e-2)), \
        float(jnp.max(jnp.abs(out - ref)))


if __name__ == "__main__":
    key = jax.random.PRNGKey(0)
    kp1, kp2, kp3, kx1, kx2, kx3 = jax.random.split(key, 6)
    B, L = 2, 16
    _run_case(kp1, kx1, B, L, 32, 64)    # projection shortcut, im2col conv path
    _run_case(kp2, kx2, B, L, 32, 32)    # identity shortcut
    _run_case(kp3, kx3, B, L, 64, 256)   # conv2 exercises the per-tap matmul path
    print("KERNEL_OK")
</pallas_src>

<mosaic_0001>
module attributes {stable_mosaic.version = 11 : i64} {
  func.func @kernel(%arg0: i32, %arg1: memref<2x16x128xf32, #tpu.memory_space<vmem>>, %arg2: memref<384x128xbf16, #tpu.memory_space<vmem>>, %arg3: memref<1x128xf32, #tpu.memory_space<vmem>>, %arg4: memref<384x128xbf16, #tpu.memory_space<vmem>>, %arg5: memref<1x128xf32, #tpu.memory_space<vmem>>, %arg6: memref<128x128xbf16, #tpu.memory_space<vmem>>, %arg7: memref<1x128xf32, #tpu.memory_space<vmem>>, %arg8: memref<2x16x128xf32, #tpu.memory_space<vmem>>, %arg9: memref<2x20x128xbf16, #tpu.memory_space<vmem>>, %arg10: memref<2x20x128xbf16, #tpu.memory_space<vmem>>) attributes {dimension_semantics = [#tpu.dimension_semantics<parallel>], iteration_bounds = array<i64: 1>, scalar_prefetch = 0 : i64, scratch_operands = 2 : i64, tpu.core_type = #tpu.core_type<tc>, window_params = [{transform_indices = @transform_0, window_bounds = array<i64: 2, 16, 128>}, {pipeline_mode = #tpu.pipeline_mode<synchronous>, transform_indices = @transform_1, window_bounds = array<i64: 384, 128>}, {pipeline_mode = #tpu.pipeline_mode<synchronous>, transform_indices = @transform_2, window_bounds = array<i64: 1, 128>}, {pipeline_mode = #tpu.pipeline_mode<synchronous>, transform_indices = @transform_3, window_bounds = array<i64: 384, 128>}, {pipeline_mode = #tpu.pipeline_mode<synchronous>, transform_indices = @transform_4, window_bounds = array<i64: 1, 128>}, {pipeline_mode = #tpu.pipeline_mode<synchronous>, transform_indices = @transform_5, window_bounds = array<i64: 128, 128>}, {pipeline_mode = #tpu.pipeline_mode<synchronous>, transform_indices = @transform_6, window_bounds = array<i64: 1, 128>}, {transform_indices = @transform_7, window_bounds = array<i64: 2, 16, 128>}]} {
    %c0 = arith.constant 0 : index
    %c0_0 = arith.constant 0 : index
    %c0_1 = arith.constant 0 : index
    %0 = vector.load %arg1[%c0, %c0_0, %c0_1] : memref<2x16x128xf32, #tpu.memory_space<vmem>>, vector<2x16x128xf32>
    %1 = arith.truncf %0 : vector<2x16x128xf32> to vector<2x16x128xbf16>
    %cst = arith.constant 0.000000e+00 : bf16
    %2 = vector.broadcast %cst : bf16 to vector<2x2x128xbf16>
    %c0_2 = arith.constant 0 : index
    %c0_3 = arith.constant 0 : index
    %c0_4 = arith.constant 0 : index
    %3 = vector.load %arg9[%c0_2, %c0_3, %c0_4] : memref<2x20x128xbf16, #tpu.memory_space<vmem>>, vector<2x2x128xbf16>
    tpu.vector_store %arg9[%c0_2, %c0_3, %c0_4], %2 {strides = array<i32>} : memref<2x20x128xbf16, #tpu.memory_space<vmem>>, vector<2x2x128xbf16>,
    %cst_5 = arith.constant 0.000000e+00 : bf16
    %4 = vector.broadcast %cst_5 : bf16 to vector<2x2x128xbf16>
    %c0_6 = arith.constant 0 : index
    %c18 = arith.constant 18 : index
    %c0_7 = arith.constant 0 : index
    %5 = vector.load %arg9[%c0_6, %c18, %c0_7] : memref<2x20x128xbf16, #tpu.memory_space<vmem>>, vector<2x2x128xbf16>
    tpu.vector_store %arg9[%c0_6, %c18, %c0_7], %4 {strides = array<i32>} : memref<2x20x128xbf16, #tpu.memory_space<vmem>>, vector<2x2x128xbf16>,
    %c0_8 = arith.constant 0 : index
    %c2 = arith.constant 2 : index
    %c0_9 = arith.constant 0 : index
    %6 = vector.load %arg9[%c0_8, %c2, %c0_9] : memref<2x20x128xbf16, #tpu.memory_space<vmem>>, vector<2x16x128xbf16>
    tpu.vector_store %arg9[%c0_8, %c2, %c0_9], %1 {strides = array<i32>} : memref<2x20x128xbf16, #tpu.memory_space<vmem>>, vector<2x16x128xbf16>,
    %c0_10 = arith.constant 0 : index
    %c1 = arith.constant 1 : index
    %c0_11 = arith.constant 0 : index
    %7 = vector.load %arg9[%c0_10, %c1, %c0_11] : memref<2x20x128xbf16, #tpu.memory_space<vmem>>, vector<2x16x128xbf16>
    %c0_12 = arith.constant 0 : index
    %c2_13 = arith.constant 2 : index
    %c0_14 = arith.constant 0 : index
    %8 = vector.load %arg9[%c0_12, %c2_13, %c0_14] : memref<2x20x128xbf16, #tpu.memory_space<vmem>>, vector<2x16x128xbf16>
    %c0_15 = arith.constant 0 : index
    %c3 = arith.constant 3 : index
    %c0_16 = arith.constant 0 : index
    %9 = vector.load %arg9[%c0_15, %c3, %c0_16] : memref<2x20x128xbf16, #tpu.memory_space<vmem>>, vector<2x16x128xbf16>
    %10 = tpu.concatenate %7, %8, %9 in 2 : vector<2x16x128xbf16>, vector<2x16x128xbf16>, vector<2x16x128xbf16> -> vector<2x16x384xbf16>
    %11 = vector.shape_cast %10 : vector<2x16x384xbf16> to vector<32x384xbf16>
    %c0_17 = arith.constant 0 : index
    %c0_18 = arith.constant 0 : index
    %12 = vector.load %arg2[%c0_17, %c0_18] : memref<384x128xbf16, #tpu.memory_space<vmem>>, vector<384x128xbf16>
    %cst_19 = arith.constant dense<0.000000e+00> : vector<32x128xf32>
    %13 = tpu.matmul %11, %12, %cst_19 {dimension_numbers = #tpu.dot_dimension_numbers<[1], [0], [0], [1], [0, 0, 1, 1], [], []>} : vector<32x384xbf16>, vector<384x128xbf16>, vector<32x128xf32> -> vector<32x128xf32>
    %c0_20 = arith.constant 0 : index
    %c0_21 = arith.constant 0 : index
    %14 = vector.load %arg3[%c0_20, %c0_21] : memref<1x128xf32, #tpu.memory_space<vmem>>, vector<1x128xf32>
    %15 = vector.broadcast %14 : vector<1x128xf32> to vector<32x128xf32>
    %16 = arith.addf %13, %15 : vector<32x128xf32>
    %cst_22 = arith.constant 0.000000e+00 : f32
    %17 = vector.broadcast %cst_22 : f32 to vector<32x128xf32>
    %18 = arith.maximumf %16, %17 : vector<32x128xf32>
    %cst_23 = arith.constant 0.000000e+00 : bf16
    %19 = vector.broadcast %cst_23 : bf16 to vector<2x2x128xbf16>
    %c0_24 = arith.constant 0 : index
    %c0_25 = arith.constant 0 : index
    %c0_26 = arith.constant 0 : index
    %20 = vector.load %arg10[%c0_24, %c0_25, %c0_26] : memref<2x20x128xbf16, #tpu.memory_space<vmem>>, vector<2x2x128xbf16>
    tpu.vector_store %arg10[%c0_24, %c0_25, %c0_26], %19 {strides = array<i32>} : memref<2x20x128xbf16, #tpu.memory_space<vmem>>, vector<2x2x128xbf16>,
    %cst_27 = arith.constant 0.000000e+00 : bf16
    %21 = vector.broadcast %cst_27 : bf16 to vector<2x2x128xbf16>
    %c0_28 = arith.constant 0 : index
    %c18_29 = arith.constant 18 : index
    %c0_30 = arith.constant 0 : index
    %22 = vector.load %arg10[%c0_28, %c18_29, %c0_30] : memref<2x20x128xbf16, #tpu.memory_space<vmem>>, vector<2x2x128xbf16>
    tpu.vector_store %arg10[%c0_28, %c18_29, %c0_30], %21 {strides = array<i32>} : memref<2x20x128xbf16, #tpu.memory_space<vmem>>, vector<2x2x128xbf16>,
    %23 = vector.shape_cast %18 : vector<32x128xf32> to vector<2x16x128xf32>
    %24 = arith.truncf %23 : vector<2x16x128xf32> to vector<2x16x128xbf16>
    %c0_31 = arith.constant 0 : index
    %c2_32 = arith.constant 2 : index
    %c0_33 = arith.constant 0 : index
    %25 = vector.load %arg10[%c0_31, %c2_32, %c0_33] : memref<2x20x128xbf16, #tpu.memory_space<vmem>>, vector<2x16x128xbf16>
    tpu.vector_store %arg10[%c0_31, %c2_32, %c0_33], %24 {strides = array<i32>} : memref<2x20x128xbf16, #tpu.memory_space<vmem>>, vector<2x16x128xbf16>,
    %c0_34 = arith.constant 0 : index
    %c1_35 = arith.constant 1 : index
    %c0_36 = arith.constant 0 : index
    %26 = vector.load %arg10[%c0_34, %c1_35, %c0_36] : memref<2x20x128xbf16, #tpu.memory_space<vmem>>, vector<2x16x128xbf16>
    %c0_37 = arith.constant 0 : index
    %c2_38 = arith.constant 2 : index
    %c0_39 = arith.constant 0 : index
    %27 = vector.load %arg10[%c0_37, %c2_38, %c0_39] : memref<2x20x128xbf16, #tpu.memory_space<vmem>>, vector<2x16x128xbf16>
    %c0_40 = arith.constant 0 : index
    %c3_41 = arith.constant 3 : index
    %c0_42 = arith.constant 0 : index
    %28 = vector.load %arg10[%c0_40, %c3_41, %c0_42] : memref<2x20x128xbf16, #tpu.memory_space<vmem>>, vector<2x16x128xbf16>
    %29 = tpu.concatenate %26, %27, %28 in 2 : vector<2x16x128xbf16>, vector<2x16x128xbf16>, vector<2x16x128xbf16> -> vector<2x16x384xbf16>
    %30 = vector.shape_cast %29 : vector<2x16x384xbf16> to vector<32x384xbf16>
    %c0_43 = arith.constant 0 : index
    %c0_44 = arith.constant 0 : index
    %31 = vector.load %arg4[%c0_43, %c0_44] : memref<384x128xbf16, #tpu.memory_space<vmem>>, vector<384x128xbf16>
    %cst_45 = arith.constant dense<0.000000e+00> : vector<32x128xf32>
    %32 = tpu.matmul %30, %31, %cst_45 {dimension_numbers = #tpu.dot_dimension_numbers<[1], [0], [0], [1], [0, 0, 1, 1], [], []>} : vector<32x384xbf16>, vector<384x128xbf16>, vector<32x128xf32> -> vector<32x128xf32>
    %c0_46 = arith.constant 0 : index
    %c0_47 = arith.constant 0 : index
    %33 = vector.load %arg5[%c0_46, %c0_47] : memref<1x128xf32, #tpu.memory_space<vmem>>, vector<1x128xf32>
    %34 = vector.broadcast %33 : vector<1x128xf32> to vector<32x128xf32>
    %35 = arith.addf %32, %34 : vector<32x128xf32>
    %cst_48 = arith.constant 0.000000e+00 : f32
    %36 = vector.broadcast %cst_48 : f32 to vector<32x128xf32>
    %37 = arith.maximumf %35, %36 : vector<32x128xf32>
    %38 = vector.shape_cast %1 : vector<2x16x128xbf16> to vector<32x128xbf16>
    %c0_49 = arith.constant 0 : index
    %c0_50 = arith.constant 0 : index
    %39 = vector.load %arg6[%c0_49, %c0_50] : memref<128x128xbf16, #tpu.memory_space<vmem>>, vector<128x128xbf16>
    %cst_51 = arith.constant dense<0.000000e+00> : vector<32x128xf32>
    %40 = tpu.matmul %38, %39, %cst_51 {dimension_numbers = #tpu.dot_dimension_numbers<[1], [0], [0], [1], [0, 0, 1, 1], [], []>} : vector<32x128xbf16>, vector<128x128xbf16>, vector<32x128xf32> -> vector<32x128xf32>
    %c0_52 = arith.constant 0 : index
    %c0_53 = arith.constant 0 : index
    %41 = vector.load %arg7[%c0_52, %c0_53] : memref<1x128xf32, #tpu.memory_space<vmem>>, vector<1x128xf32>
    %42 = vector.broadcast %41 : vector<1x128xf32> to vector<32x128xf32>
    %43 = arith.addf %40, %42 : vector<32x128xf32>
    %44 = arith.addf %37, %43 : vector<32x128xf32>
    %45 = vector.shape_cast %44 : vector<32x128xf32> to vector<2x16x128xf32>
    %c0_54 = arith.constant 0 : index
    %c0_55 = arith.constant 0 : index
    %c0_56 = arith.constant 0 : index
    %46 = vector.load %arg8[%c0_54, %c0_55, %c0_56] : memref<2x16x128xf32, #tpu.memory_space<vmem>>, vector<2x16x128xf32>
    tpu.vector_store %arg8[%c0_54, %c0_55, %c0_56], %45 {strides = array<i32>} : memref<2x16x128xf32, #tpu.memory_space<vmem>>, vector<2x16x128xf32>,
    return
  }
  func.func @transform_0(%arg0: i32) -> (i32, i32, i32) {
    %c0_i32 = arith.constant 0 : i32
    %c0_i32_0 = arith.constant 0 : i32
    %c0_i32_1 = arith.constant 0 : i32
    return %arg0, %c0_i32, %c0_i32_0 : i32, i32, i32
  }
  func.func @transform_1(%arg0: i32) -> (i32, i32) {
    %c0_i32 = arith.constant 0 : i32
    %c0_i32_0 = arith.constant 0 : i32
    %c0_i32_1 = arith.constant 0 : i32
    return %c0_i32, %c0_i32_0 : i32, i32
  }
  func.func @transform_2(%arg0: i32) -> (i32, i32) {
    %c0_i32 = arith.constant 0 : i32
    %c0_i32_0 = arith.constant 0 : i32
    %c0_i32_1 = arith.constant 0 : i32
    return %c0_i32, %c0_i32_0 : i32, i32
  }
  func.func @transform_3(%arg0: i32) -> (i32, i32) {
    %c0_i32 = arith.constant 0 : i32
    %c0_i32_0 = arith.constant 0 : i32
    %c0_i32_1 = arith.constant 0 : i32
    return %c0_i32, %c0_i32_0 : i32, i32
  }
  func.func @transform_4(%arg0: i32) -> (i32, i32) {
    %c0_i32 = arith.constant 0 : i32
    %c0_i32_0 = arith.constant 0 : i32
    %c0_i32_1 = arith.constant 0 : i32
    return %c0_i32, %c0_i32_0 : i32, i32
  }
  func.func @transform_5(%arg0: i32) -> (i32, i32) {
    %c0_i32 = arith.constant 0 : i32
    %c0_i32_0 = arith.constant 0 : i32
    %c0_i32_1 = arith.constant 0 : i32
    return %c0_i32, %c0_i32_0 : i32, i32
  }
  func.func @transform_6(%arg0: i32) -> (i32, i32) {
    %c0_i32 = arith.constant 0 : i32
    %c0_i32_0 = arith.constant 0 : i32
    %c0_i32_1 = arith.constant 0 : i32
    return %c0_i32, %c0_i32_0 : i32, i32
  }
  func.func @transform_7(%arg0: i32) -> (i32, i32, i32) {
    %c0_i32 = arith.constant 0 : i32
    %c0_i32_0 = arith.constant 0 : i32
    %c0_i32_1 = arith.constant 0 : i32
    return %arg0, %c0_i32, %c0_i32_0 : i32, i32, i32
  }
}

</mosaic_0001>

<bundles_post_ra>
// kernel: residual_block.1
= control target key start
LH: loop header
LB: loop body
LE: loop exit
PB: predicated region body
PF: predicated region fallthrough
CT: control target
= control target key end

     0   :  { %12 = vsyncpa [#allocation5], 0  ;;  %s1681_s0 = inlined_call_operand.vmem [shape: f32[2,16,128], index: 0, kind: input, shape index: {}]   ;;  %s1682_s1 = inlined_call_operand.hbm [shape: bf16[384,128], index: 1, kind: input, shape index: {}]   ;;  %s1683_s2 = inlined_call_operand.vmem [shape: f32[1,128], index: 2, kind: input, shape index: {}]   ;;  %s1684_s3 = inlined_call_operand.hbm [shape: bf16[384,128], index: 3, kind: input, shape index: {}]   ;;  %s1685_s4 = inlined_call_operand.vmem [shape: f32[1,128], index: 4, kind: input, shape index: {}]   ;;  %s1686_s5 = inlined_call_operand.vmem [shape: bf16[128,128], index: 5, kind: input, shape index: {}]   ;;  %s1687_s6 = inlined_call_operand.vmem [shape: f32[1,128], index: 6, kind: input, shape index: {}]   ;;  %s1688_s7 = inlined_call_operand.vmem [shape: f32[2,16,128], index: 7, kind: output, shape index: {}]  }
   0x1   :  { %13 = vsyncpa [#allocation7], 0  ;;  %s1517_s24 = smov [#allocation4]  }
   0x2   :  { %s21_s25 = sshll.u32 %s1517_s24, 4  ;;  %s22_s25 = int_to_ptr.vmem [resolvable:$true] %s21_s25 }
   0x3   :  { %s1481_s26 = scalar_lea.vmem %s22_s25, 3072  ;;  %p1486_p1 = scmp.lt.s32.totalorder %s22_s25, %s22_s25 }
   0x4   :  { %p1482_p0 = scmp.ne.s32.totalorder %s22_s25, %s1481_s26  ;;  %p1487_p2 = scmp.lt.s32.totalorder %s1481_s26, %s1481_s26 }
   0x6   :  { %p1488_p3 = por %p1487_p2, %p1486_p1 }
   0x8   :  { %p1489_p4 = pnand %p1488_p3, %p1482_p0 }
   0xa   :  { %1492 = shalt.err (!%p1489_p4)
}
   0xb   :  { %s1518_s27 = smov 64   ;;  %s1519_s28 = smov 4  }
   0xc   :  { %27 = dma.hbm_to_vmem [thread:$0]  %s1682_s1, 3072, %s22_s25, [#allocation5], %s1518_s27, %s1518_s27, %s1519_s28  }
   0xd   :  { %s1520_s8 = smov [#allocation6]  }
   0xe   :  { %s35_s9 = sshll.u32 %s1520_s8, 4  ;;  %s36_s9 = int_to_ptr.vmem [resolvable:$true] %s35_s9 }
   0xf   :  { %s1501_s10 = scalar_lea.vmem %s36_s9, 3072  ;;  %p1506_p6 = scmp.lt.s32.totalorder %s36_s9, %s36_s9 }
  0x10   :  { %p1502_p5 = scmp.ne.s32.totalorder %s36_s9, %s1501_s10  ;;  %p1507_p7 = scmp.lt.s32.totalorder %s1501_s10, %s1501_s10 }
  0x12   :  { %p1508_p8 = por %p1507_p7, %p1506_p6 }
  0x14   :  { %p1509_p9 = pnand %p1508_p8, %p1502_p5 }
  0x16   :  { %1512 = shalt.err (!%p1509_p9)
}
  0x17   :  { %41 = dma.hbm_to_vmem [thread:$0]  %s1684_s3, 3072, %s36_s9, [#allocation7], %s1518_s27, %s1518_s27, %s1519_s28  }
  0x18   :  { %1513 = dma.done.wait [#allocation5], 3072  }
  0x19   :  { %1514 = vsyncadd [#allocation5], 4294964224 }
  0x1a   :  { %1515 = dma.done.wait [#allocation7], 3072  }
  0x1b   :  { %1516 = vsyncadd [#allocation7], 4294964224  ;;  %v1521_v0 = vmov 0   ;;  %v1402_v1 = vld [vmem:[#allocation4 + $0x78] sm:$0xff]   ;;  %v1405_v4 = vld [vmem:[#allocation4 + $0x70] sm:$0xff]   ;;  %vm75_vm0 = vcmask 1040384  }
  0x1c   :  { %61 = vst [vmem:[#allocation2] sm:$0x1] %v1521_v0  ;;  %62 = vst [vmem:[#allocation2 + $0xc] sm:$0x1] %v1521_v0  ;;  %v1403_v2 = vld [vmem:[#allocation4 + $0xb8] sm:$0xff]   ;;  %1251 = vmatprep.subr.bf16.mxu0 %v1402_v1  ;;  %v1406_v5 = vld [vmem:[#allocation4 + $0xb0] sm:$0xff]  }
  0x1d   :  { %545 = vst [vmem:[#allocation3] sm:$0x1] %v1521_v0  ;;  %546 = vst [vmem:[#allocation3 + $0xc] sm:$0x1] %v1521_v0  ;;  %v1404_v3 = vld [vmem:[#allocation4 + $0x38] sm:$0xff]   ;;  %1337 = vmatprep.subr.bf16.mxu1 %v1403_v2  ;;  %v1407_v6 = vld [vmem:[#allocation4 + $0x30] sm:$0xff]  }
  0x1e   :  { %1252 = vmatpush3.bf16.msra.mxu0 %v1404_v3  ;;  %1338 = vmatpush3.bf16.msra.mxu1 %v1403_v2  ;;  %v1408_v7 = vld [vmem:[#allocation4 + $0x68] sm:$0xff]   ;;  %v1411_v10 = vld [vmem:[#allocation4 + $0x60] sm:$0xff]   ;;  %v1414_v13 = vld [vmem:[#allocation4 + $0x58] sm:$0xff]   ;;  %vm76_vm1 = vcmask 1044484   ;;  %vm132_vm3 = vsmask.f32 7424 }
  0x1f   :  { %1253 = vmatprep.subr.bf16.mxu0 %v1405_v4  ;;  %1339 = vmatprep.subr.bf16.mxu1 %v1406_v5  ;;  %v1409_v8 = vld [vmem:[#allocation4 + $0xa8] sm:$0xff]   ;;  %v1412_v11 = vld [vmem:[#allocation4 + $0xa0] sm:$0xff]   ;;  %v1415_v14 = vld [vmem:[#allocation4 + $0x98] sm:$0xff]   ;;  %vm167_vm4 = vcmask 1046528  }
  0x20   :  { %v1410_v9 = vld [vmem:[#allocation4 + $0x28] sm:$0xff]   ;;  %v1413_v12 = vld [vmem:[#allocation4 + $0x20] sm:$0xff]   ;;  %v1416_v15 = vld [vmem:[#allocation4 + $0x18] sm:$0xff]  }
  0x21   :  { %v1417_v16 = vld [vmem:[#allocation4 + $0x50] sm:$0xff]   ;;  %v1420_v19 = vld [vmem:[#allocation4 + $0x48] sm:$0xff]   ;;  %v1423_v22 = vld [vmem:[#allocation4 + $0x40] sm:$0xff]  }
  0x22   :  { %1254 = vmatpush3.bf16.msra.mxu0 %v1407_v6  ;;  %1340 = vmatpush3.bf16.msra.mxu1 %v1406_v5  ;;  %v1418_v17 = vld [vmem:[#allocation4 + $0x90] sm:$0xff]   ;;  %v1421_v20 = vld [vmem:[#allocation4 + $0x88] sm:$0xff]   ;;  %v1424_v23 = vld [vmem:[#allocation4 + $0x80] sm:$0xff]  }
  0x23   :  { %1255 = vmatprep.subr.bf16.mxu0 %v1408_v7  ;;  %1341 = vmatprep.subr.bf16.mxu1 %v1409_v8  ;;  %v1419_v18 = vld [vmem:[#allocation4 + $0x10] sm:$0xff]   ;;  %v1422_v21 = vld [vmem:[#allocation4 + $0x8] sm:$0xff]   ;;  %v1576_v25 = vld [vmem:[%s1681_s0 + $0x8] sm:$0xff] }
  0x24   :  { %v1571_v24 = vld [vmem:[%s1681_s0] sm:$0xff]  ;;  %v1581_v26 = vld [vmem:[%s1681_s0 + $0x10] sm:$0xff]  ;;  %v1244_v28 = vpack.c.bf16 %v1576_v25, %v1576_v25  ;;  %v1590_v29 = vld [vmem:[%s1681_s0 + $0x18] sm:$0xff] }
  0x25   :  { %v1243_v27 = vpack.c.bf16 %v1571_v24, %v1571_v24  ;;  %v1245_v30 = vpack.c.bf16 %v1581_v26, %v1581_v26  ;;  %v1246_v31 = vpack.c.bf16 %v1590_v29, %v1590_v29  ;;  %vm1596_vm2 = vmor %vm75_vm0, %vm76_vm1  ;;  %v1425_v36 = vld [vmem:[#allocation4] sm:$0xff]  }
  0x26   :  { %1256 = vmatpush3.bf16.msra.mxu0 %v1410_v9  ;;  %1342 = vmatpush3.bf16.msra.mxu1 %v1409_v8  ;;  %v80_v34 = vrot.slane %v1244_v28, 7 }
  0x27   :  { %1257 = vmatprep.subr.bf16.mxu0 %v1411_v10  ;;  %1343 = vmatprep.subr.bf16.mxu1 %v1412_v11  ;;  %v78_v33 = vrot.slane %v1243_v27, 7  ;;  %v83_v35 = vrot.slane %v1245_v30, 7  ;;  %v85_v37 = vrot.slane %v1246_v31, 7 }
  0x28   :  { %v82_v39 = vrot.slane %v80_v34, 4 }
  0x29   :  { %v79_v38 = vrot.slane %v78_v33, 4  ;;  %94 = vst [vmem:[#allocation2] sm:$0xe] %v78_v33  ;;  %v84_v40 = vrot.slane %v83_v35, 4  ;;  %97 = vst [vmem:[#allocation2 + $0xc] sm:$0xe] %v83_v35 }
  0x2a   :  { %1258 = vmatpush3.bf16.msra.mxu0 %v1413_v12  ;;  %1344 = vmatpush3.bf16.msra.mxu1 %v1412_v11  ;;  %v87_v41 = vrot.slane %v85_v37, 4  ;;  %96 = vst [vmem:[#allocation2 + $0x8] sm:$0x1] %v82_v39 }
  0x2b   :  { %1259 = vmatprep.subr.bf16.mxu0 %v1414_v13  ;;  %1345 = vmatprep.subr.bf16.mxu1 %v1415_v14  ;;  %v81_v42 = vsel %vm1596_vm2, %v79_v38, %v80_v34  ;;  %v86_v43 = vsel %vm1596_vm2, %v84_v40, %v85_v37 }
  0x2c   :  { %95 = vst [vmem:[#allocation2 + $0x4] sm:$0xf] %v81_v42  ;;  %98 = vst [vmem:[#allocation2 + $0x10] sm:$0xf] %v86_v43 }
  0x2d   :  { %99 = vst [vmem:[#allocation2 + $0x14] sm:$0x1] %v87_v41 }
  0x2e   :  { %1260 = vmatpush3.bf16.msra.mxu0 %v1416_v15  ;;  %1346 = vmatpush3.bf16.msra.mxu1 %v1415_v14 }
  0x2f   :  { %1261 = vmatprep.subr.bf16.mxu0 %v1417_v16  ;;  %1347 = vmatprep.subr.bf16.mxu1 %v1418_v17 }
  0x30   :  { %v106_v44 = vld [vmem:[#allocation2] sm:$0xe]  ;;  %v107_v46 = vld [vmem:[#allocation2 + $0xc] sm:$0xe] }
  0x31   :  { %v100_v45 = vld [vmem:[#allocation2] sm:$0xf]  ;;  %v103_v47 = vld [vmem:[#allocation2 + $0xc] sm:$0xf] }
  0x32   :  { %1262 = vmatpush3.bf16.msra.mxu0 %v1419_v18  ;;  %1348 = vmatpush3.bf16.msra.mxu1 %v1418_v17  ;;  %v1426_v48 = vld [vmem:[#allocation2 + $0x8] ss:$0 sps:$4 sm:$0x11]  }
  0x33   :  { %1263 = vmatprep.subr.bf16.mxu0 %v1420_v19  ;;  %1349 = vmatprep.subr.bf16.mxu1 %v1421_v20  ;;  %v101_v49 = vld [vmem:[#allocation2 + $0x4] sm:$0xf]  ;;  %v104_v50 = vld [vmem:[#allocation2 + $0x10] sm:$0xf]  ;;  %v141_v52 = vshll.u32 %v1426_v48, 16  ;;  %v145_v53 = vshrl.u32 %v1426_v48, 16 }
  0x34   :  { %v1168_v51 = vcombine.low %v106_v44, %v101_v49  ;;  %v1428_v54 = vld [vmem:[#allocation2 + $0x8] ss:$0 sps:$4 sm:$0x33]   ;;  %v1164_v55 = vcombine.low %v100_v45, %v101_v49  ;;  %v1169_v56 = vcombine.low %v107_v46, %v104_v50  ;;  %v1430_v57 = vld [vmem:[#allocation2 + $0x14] ss:$0 sps:$4 sm:$0x33]   ;;  %v1166_v60 = vcombine.low %v103_v47, %v104_v50 }
  0x35   :  { %v143_v61 = vrot.slane %v141_v52, 1  ;;  %v169_v63 = vrot.slane %v1428_v54, 1  ;;  %v190_v2 = vshll.u32 %v145_v53, 16  ;;  %v172_v4 = vrot.slane %v1430_v57, 1 }
  0x36   :  { %1264 = vmatpush3.bf16.msra.mxu0 %v1422_v21  ;;  %1350 = vmatpush3.bf16.msra.mxu1 %v1421_v20  ;;  %v134_v58 = vshrl.u32 %v1168_v51, 16  ;;  %v136_v59 = vshll.u32 %v1168_v51, 16  ;;  %v168_v62 = vrot.slane %v1168_v51, 1  ;;  %v177_v0 = vshll.u32 %v1164_v55, 16 }
  0x37   :  { %1265 = vmatprep.subr.bf16.mxu0 %v1423_v22  ;;  %1351 = vmatprep.subr.bf16.mxu1 %v1424_v23  ;;  %v171_v3 = vrot.slane %v1169_v56, 1  ;;  %v202_v6 = vshll.u32 %v169_v63, 16  ;;  %v175_v7 = vshrl.u32 %v1164_v55, 16  ;;  %v1431_v9 = vld [vmem:[#allocation2 + $0x14] ss:$0 sps:$4 sm:$0x11]  }
  0x38   :  { %v138_v1 = vrot.slane %v136_v59, 1  ;;  %v170_v5 = vsel %vm167_vm4, %v168_v62, %v169_v63  ;;  %v179_v8 = vrot.slane %v177_v0, 1  ;;  %v148_v17 = vshrl.u32 %v1169_v56, 16  ;;  %v1433_v59 = vld [vmem:[#allocation6 + $0x78] sm:$0xff]   ;;  %v1436_v63 = vld [vmem:[#allocation6 + $0x30] sm:$0xff]   ;;  %v1438_v0 = vld [vmem:[#allocation6 + $0x68] sm:$0xff]  }
  0x39   :  { %v195_v11 = vshrl.u32 %v170_v5, 16  ;;  %v197_v12 = vshll.u32 %v170_v5, 16  ;;  %v173_v13 = vsel %vm167_vm4, %v171_v3, %v172_v4  ;;  %v204_v14 = vrot.slane %v202_v6, 1  ;;  %v1437_v62 = vld [vmem:[#allocation6 + $0xb8] sm:$0xff]   ;;  %v1441_v3 = vld [vmem:[#allocation6 + $0x60] sm:$0xff]  }
  0x3a   :  { %1266 = vmatpush3.bf16.msra.mxu0 %v1425_v36  ;;  %1352 = vmatpush3.bf16.msra.mxu1 %v1424_v23  ;;  %v139_v10 = vor.u32 %v138_v1, %v134_v58  ;;  %v227_v15 = vshrl.u32 %v173_v13, 16  ;;  %v229_v16 = vshll.u32 %v173_v13, 16  ;;  %v234_v20 = vshll.u32 %v172_v4, 16  ;;  %v1440_v1 = vld [vmem:[#allocation6 + $0xb0] sm:$0xff]   ;;  %v1443_v4 = vld [vmem:[#allocation6 + $0xa8] sm:$0xff]   ;;  %v1442_v5 = vld [vmem:[#allocation6 + $0x20] sm:$0xff]  }
  0x3b   :  { %v199_v19 = vrot.slane %v197_v12, 1  ;;  %v150_v21 = vshll.u32 %v1169_v56, 16  ;;  %v180_v27 = vor.u32 %v179_v8, %v175_v7  ;;  %v155_v34 = vshll.u32 %v1431_v9, 16  ;;  %1289 = vmatprep.subr.bf16.mxu0 %v1433_v59  ;;  %1357 = vmatprep.subr.bf16.mxu1 %v1437_v62  ;;  %v1444_v6 = vld [vmem:[#allocation6 + $0x58] sm:$0xff]   ;;  %v1446_v7 = vld [vmem:[#allocation6 + $0xa0] sm:$0xff]   ;;  %v1450_v12 = vld [vmem:[#allocation6 + $0x48] sm:$0xff]  }
  0x3c   :  { %v144_v18 = vsel %vm132_vm3, %v139_v10, %v143_v61  ;;  %v231_v28 = vrot.slane %v229_v16, 1  ;;  %v236_v31 = vrot.slane %v234_v20, 1  ;;  %v192_v36 = vrot.slane %v190_v2, 1  ;;  %v1439_v2 = vld [vmem:[#allocation6 + $0x28] sm:$0xff]   ;;  %v1445_v8 = vld [vmem:[#allocation6 + $0x18] sm:$0xff]   ;;  %v1448_v10 = vld [vmem:[#allocation6 + $0x10] sm:$0xff]  }
  0x3d   :  { %v183_v22 = vshrl.u32 %v144_v18, 16  ;;  %v185_v23 = vshll.u32 %v144_v18, 16  ;;  %v200_v30 = vor.u32 %v199_v19, %v195_v11  ;;  %v152_v33 = vrot.slane %v150_v21, 1  ;;  %v1449_v11 = vld [vmem:[#allocation6 + $0x98] sm:$0xff]   ;;  %v1452_v13 = vld [vmem:[#allocation6 + $0x90] sm:$0xff]   ;;  %v1455_v16 = vld [vmem:[#allocation6 + $0x88] sm:$0xff]  }
  0x3e   :  { %v232_v37 = vor.u32 %v231_v28, %v227_v15  ;;  %v159_v38 = vshrl.u32 %v1431_v9, 16  ;;  %v157_v41 = vrot.slane %v155_v34, 1  ;;  %v209_v42 = vshll.u32 %v1166_v60, 16  ;;  %v1447_v9 = vld [vmem:[#allocation6 + $0x50] sm:$0xff]   ;;  %v1453_v15 = vld [vmem:[#allocation6 + $0x40] sm:$0xff]   ;;  %v1617_v18 = vld [vmem:[%s1686_s5 + $0x38] sm:$0xff]  }
  0x3f   :  { %v187_v35 = vrot.slane %v185_v23, 1  ;;  %v205_v39 = vsel %vm132_vm3, %v200_v30, %v204_v14  ;;  %v153_v40 = vor.u32 %v152_v33, %v148_v17  ;;  %v181_v46 = vsel %vm132_vm3, %v180_v27, %v143_v61  ;;  %v1434_v61 = vld [vmem:[#allocation6 + $0x38] sm:$0xff]   ;;  %v1451_v14 = vld [vmem:[#allocation6 + $0x8] sm:$0xff]   ;;  %v1454_v17 = vld [vmem:[#allocation6] sm:$0xff]  }
  0x40   :  { %1353 = vmatprep.mubr.bf16.mxu1 %v205_v39  ;;  %v237_v44 = vsel %vm132_vm3, %v232_v37, %v236_v31  ;;  %v222_v45 = vshll.u32 %v159_v38, 16  ;;  %v207_v48 = vshrl.u32 %v1166_v60, 16  ;;  %v211_v49 = vrot.slane %v209_v42, 1  ;;  %v1435_v60 = vld [vmem:[#allocation6 + $0x70] sm:$0xff]   ;;  %v1461_v19 = vld [vmem:[#allocation6 + $0x80] sm:$0xff]  }
  0x41   :  { %v188_v43 = vor.u32 %v187_v35, %v183_v22  ;;  %1354 = vmatmul.mubr.bf16.vlgmr.msra.gmra.mxu1 %v237_v44  ;;  %v158_v47 = vsel %vm132_vm3, %v153_v40, %v157_v41  ;;  %v1172_v23 = vld [vmem:[%s1683_s2] ss:$0 sm:$0xff] }
  0x42   :  { %v215_v51 = vshrl.u32 %v158_v47, 16  ;;  %v217_v52 = vshll.u32 %v158_v47, 16  ;;  %v224_v54 = vrot.slane %v222_v45, 1  ;;  %v212_v55 = vor.u32 %v211_v49, %v207_v48  ;;  %1358 = vmatpush3.bf16.msra.mxu1 %v1437_v62 }
  0x43   :  { %v193_v50 = vsel %vm132_vm3, %v188_v43, %v192_v36  ;;  %1359 = vmatprep.subr.bf16.mxu1 %v1440_v1 }
  0x44   :  { %475 = vmatprep.mubr.bf16.mxu0 %v193_v50  ;;  %v219_v53 = vrot.slane %v217_v52, 1  ;;  %v213_v58 = vsel %vm132_vm3, %v212_v55, %v157_v41 }
  0x45   :  { %476 = vmatmul.mubr.bf16.vlgmr.msra.gmra.mxu0 %v181_v46 }
  0x46   :  { %v220_v56 = vor.u32 %v219_v53, %v215_v51  ;;  %1290 = vmatpush3.bf16.msra.mxu0 %v1434_v61  ;;  %1360 = vmatpush3.bf16.msra.mxu1 %v1440_v1 }
  0x47   :  { %1291 = vmatprep.subr.bf16.mxu0 %v1435_v60  ;;  %1361 = vmatprep.subr.bf16.mxu1 %v1443_v4 }
  0x48   :  { %v225_v57 = vsel %vm132_vm3, %v220_v56, %v224_v54 }
  0x49   :  { %483 = vmatprep.mubr.bf16.mxu0 %v225_v57 }
  0x4a   :  { %1292 = vmatpush3.bf16.msra.mxu0 %v1436_v63  ;;  %1362 = vmatpush3.bf16.msra.mxu1 %v1443_v4 }
  0x4b   :  { %1293 = vmatprep.subr.bf16.mxu0 %v1438_v0  ;;  %1363 = vmatprep.subr.bf16.mxu1 %v1446_v7 }
  0x4d   :  { %484 = vmatmul.mubr.bf16.gmra.mxu0 %v213_v58 }
  0x4e   :  { %1294 = vmatpush3.bf16.msra.mxu0 %v1439_v2  ;;  %1364 = vmatpush3.bf16.msra.mxu1 %v1446_v7 }
  0x4f   :  { %1295 = vmatprep.subr.bf16.mxu0 %v1441_v3  ;;  %1365 = vmatprep.subr.bf16.mxu1 %v1449_v11 }
  0x52   :  { %1296 = vmatpush3.bf16.msra.mxu0 %v1442_v5  ;;  %1366 = vmatpush3.bf16.msra.mxu1 %v1449_v11 }
  0x53   :  { %1297 = vmatprep.subr.bf16.mxu0 %v1444_v6  ;;  %1367 = vmatprep.subr.bf16.mxu1 %v1452_v13 }
  0x56   :  { %1298 = vmatpush3.bf16.msra.mxu0 %v1445_v8  ;;  %1368 = vmatpush3.bf16.msra.mxu1 %v1452_v13 }
  0x57   :  { %1299 = vmatprep.subr.bf16.mxu0 %v1447_v9  ;;  %1369 = vmatprep.subr.bf16.mxu1 %v1455_v16 }
  0x5a   :  { %1300 = vmatpush3.bf16.msra.mxu0 %v1448_v10  ;;  %1370 = vmatpush3.bf16.msra.mxu1 %v1455_v16 }
  0x5b   :  { %1301 = vmatprep.subr.bf16.mxu0 %v1450_v12  ;;  %1371 = vmatprep.subr.bf16.mxu1 %v1461_v19 }
  0x5e   :  { %1302 = vmatpush3.bf16.msra.mxu0 %v1451_v14  ;;  %1372 = vmatpush3.bf16.msra.mxu1 %v1461_v19 }
  0x5f   :  { %1303 = vmatprep.subr.bf16.mxu0 %v1453_v15 }
  0x62   :  { %1304 = vmatpush3.bf16.msra.mxu0 %v1454_v17 }
  0x63   :  { %1377 = vmatprep.subr.bf16.mxu0 %v1617_v18 }
 0x101   :  { %v1355_v20 = vpop.f32.mrf.mxu1 }
 0x103   :  { %v526_v27 = vpop.f32.mrf.mxu1 }
 0x105   :  { %v1267_v21 = vpop.f32.mrf.mxu0  ;;  %v1356_v33 = vpop.f32.mrf.mxu1 }
 0x107   :  { %v1268_v22 = vpop.f32.mrf.mxu0  ;;  %v529_v40 = vpop.f32.mrf.mxu1 }
 0x108   :  { %v1269_v28 = vadd.f32 %v1268_v22, %v1267_v21 }
 0x109   :  { %v1270_v30 = vpop.f32.mrf.mxu0 }
 0x10a   :  { %v478_v31 = vadd.f32 %v1269_v28, %v1172_v23 }
 0x10b   :  { %v1271_v34 = vpop.f32.mrf.mxu0 }
 0x10c   :  { %v527_v35 = vadd.f32 %v526_v27, %v478_v31  ;;  %v1272_v36 = vadd.f32 %v1271_v34, %v1270_v30 }
 0x10d   :  { %v1273_v37 = vpop.f32.mrf.mxu0 }
 0x10e   :  { %v541_v38 = vmax.f32 %v527_v35, 0.0  ;;  %v481_v39 = vadd.f32 %v1272_v36, %v1172_v23 }
 0x10f   :  { %v1274_v41 = vpop.f32.mrf.mxu0 }
 0x110   :  { %v1247_v42 = vpack.c.bf16 %v541_v38, %v541_v38  ;;  %v530_v43 = vadd.f32 %v529_v40, %v481_v39  ;;  %v1275_v44 = vadd.f32 %v1274_v41, %v1273_v37 }
 0x111   :  { %v1276_v45 = vpop.f32.mrf.mxu0 }
 0x112   :  { %v561_v46 = vrot.slane %v1247_v42, 7  ;;  %v542_v47 = vmax.f32 %v530_v43, 0.0  ;;  %v486_v48 = vadd.f32 %v1275_v44, %v1172_v23 }
 0x113   :  { %v1277_v49 = vpop.f32.mrf.mxu0 }
 0x114   :  { %577 = vst [vmem:[#allocation3] sm:$0xe] %v561_v46  ;;  %v1248_v50 = vpack.c.bf16 %v542_v47, %v542_v47  ;;  %v535_v51 = vadd.f32 %v1355_v20, %v486_v48  ;;  %v1278_v52 = vadd.f32 %v1277_v49, %v1276_v45  ;;  %v562_v53 = vrot.slane %v561_v46, 4 }
 0x116   :  { %v563_v54 = vrot.slane %v1248_v50, 7  ;;  %v543_v55 = vmax.f32 %v535_v51, 0.0  ;;  %v489_v56 = vadd.f32 %v1278_v52, %v1172_v23 }
 0x118   :  { %v564_v57 = vsel %vm1596_vm2, %v562_v53, %v563_v54  ;;  %v565_v58 = vrot.slane %v563_v54, 4  ;;  %v1249_v59 = vpack.c.bf16 %v543_v55, %v543_v55  ;;  %v538_v61 = vadd.f32 %v1356_v33, %v489_v56 }
 0x119   :  { %578 = vst [vmem:[#allocation3 + $0x4] sm:$0xf] %v564_v57 }
 0x11a   :  { %579 = vst [vmem:[#allocation3 + $0x8] sm:$0x1] %v565_v58  ;;  %v566_v60 = vrot.slane %v1249_v59, 7  ;;  %v544_v62 = vmax.f32 %v538_v61, 0.0 }
 0x11b   :  { %v589_v2 = vld [vmem:[#allocation3] sm:$0xe] }
 0x11c   :  { %580 = vst [vmem:[#allocation3 + $0xc] sm:$0xe] %v566_v60  ;;  %v1250_v63 = vpack.c.bf16 %v544_v62, %v544_v62  ;;  %v567_v0 = vrot.slane %v566_v60, 4  ;;  %v583_v6 = vld [vmem:[#allocation3] sm:$0xf] }
 0x11e   :  { %v568_v1 = vrot.slane %v1250_v63, 7 }
 0x120   :  { %v569_v3 = vsel %vm1596_vm2, %v567_v0, %v568_v1  ;;  %v570_v4 = vrot.slane %v568_v1, 4  ;;  %v584_v5 = vld [vmem:[#allocation3 + $0x4] sm:$0xf]  ;;  %v1462_v0 = vld [vmem:[%s1686_s5 + $0x30] sm:$0xff]  }
 0x121   :  { %581 = vst [vmem:[#allocation3 + $0x10] sm:$0xf] %v569_v3  ;;  %v1205_v7 = vcombine.low %v589_v2, %v584_v5  ;;  %v1457_v8 = vld [vmem:[#allocation3 + $0x8] ss:$0 sps:$4 sm:$0x33]   ;;  %v1201_v9 = vcombine.low %v583_v6, %v584_v5 }
 0x122   :  { %582 = vst [vmem:[#allocation3 + $0x14] sm:$0x1] %v570_v4  ;;  %v1458_v10 = vld [vmem:[#allocation3 + $0x8] ss:$0 sps:$4 sm:$0x11]   ;;  %v650_v12 = vrot.slane %v1457_v8, 1 }
 0x123   :  { %v649_v11 = vrot.slane %v1205_v7, 1  ;;  %v618_v13 = vshll.u32 %v1205_v7, 16  ;;  %v623_v14 = vshll.u32 %v1458_v10, 16  ;;  %v627_v15 = vshrl.u32 %v1458_v10, 16  ;;  %v590_v28 = vld [vmem:[#allocation3 + $0xc] sm:$0xe] }
 0x124   :  { %v616_v17 = vshrl.u32 %v1205_v7, 16  ;;  %v658_v32 = vshll.u32 %v1201_v9, 16  ;;  %v683_v21 = vshll.u32 %v650_v12, 16  ;;  %v656_v33 = vshrl.u32 %v1201_v9, 16  ;;  %v586_v42 = vld [vmem:[#allocation3 + $0xc] sm:$0xf] }
 0x125   :  { %v651_v16 = vsel %vm167_vm4, %v649_v11, %v650_v12  ;;  %v620_v19 = vrot.slane %v618_v13, 1  ;;  %v625_v23 = vrot.slane %v623_v14, 1  ;;  %v671_v27 = vshll.u32 %v627_v15, 16  ;;  %v1466_v12 = vld [vmem:[%s1686_s5 + $0x28] sm:$0xff]  }
 0x126   :  { %v678_v20 = vshll.u32 %v651_v16, 16  ;;  %v676_v30 = vshrl.u32 %v651_v16, 16  ;;  %v660_v36 = vrot.slane %v658_v32, 1  ;;  %v685_v40 = vrot.slane %v683_v21, 1 }
 0x127   :  { %v621_v22 = vor.u32 %v620_v19, %v616_v17  ;;  %v673_v43 = vrot.slane %v671_v27, 1  ;;  %v60_v27 = vpack.c.bf16 %v1590_v29, %v1581_v26 }
 0x128   :  { %v680_v31 = vrot.slane %v678_v20, 1  ;;  %v587_v34 = vld [vmem:[#allocation3 + $0x10] sm:$0xf]  ;;  %v661_v52 = vor.u32 %v660_v36, %v656_v33  ;;  %v1468_v20 = vld [vmem:[%s1686_s5 + $0x20] sm:$0xff]  }
 0x129   :  { %v626_v35 = vsel %vm132_vm3, %v621_v22, %v625_v23  ;;  %v1206_v37 = vcombine.low %v590_v28, %v587_v34  ;;  %v1464_v38 = vld [vmem:[#allocation3 + $0x14] ss:$0 sps:$4 sm:$0x33]   ;;  %v1203_v47 = vcombine.low %v586_v42, %v587_v34  ;;  %v1469_v22 = vld [vmem:[%s1686_s5 + $0x18] sm:$0xff]  }
 0x12a   :  { %v681_v39 = vor.u32 %v680_v31, %v676_v30  ;;  %v666_v41 = vshll.u32 %v626_v35, 16  ;;  %v653_v45 = vrot.slane %v1464_v38, 1  ;;  %v1465_v46 = vld [vmem:[#allocation3 + $0x14] ss:$0 sps:$4 sm:$0x11]   ;;  %v664_v49 = vshrl.u32 %v626_v35, 16 }
 0x12b   :  { %v652_v44 = vrot.slane %v1206_v37, 1  ;;  %v632_v51 = vshll.u32 %v1206_v37, 16  ;;  %v630_v54 = vshrl.u32 %v1206_v37, 16  ;;  %v637_v55 = vshll.u32 %v1465_v46, 16 }
 0x12c   :  { %v686_v48 = vsel %vm132_vm3, %v681_v39, %v685_v40  ;;  %v668_v50 = vrot.slane %v666_v41, 1  ;;  %v715_v58 = vshll.u32 %v653_v45, 16  ;;  %v641_v60 = vshrl.u32 %v1465_v46, 16  ;;  %v1209_v41 = vld [vmem:[%s1685_s4] ss:$0 sm:$0xff] }
 0x12d   :  { %1373 = vmatprep.mubr.bf16.mxu1 %v686_v48  ;;  %v654_v53 = vsel %vm167_vm4, %v652_v44, %v653_v45  ;;  %v634_v59 = vrot.slane %v632_v51, 1  ;;  %v690_v62 = vshll.u32 %v1203_v47, 16  ;;  %v639_v3 = vrot.slane %v637_v55, 1  ;;  %v1234_v48 = vld [vmem:[%s1687_s6] ss:$0 sm:$0xff] }
 0x12e   :  { %v669_v56 = vor.u32 %v668_v50, %v664_v49  ;;  %v710_v57 = vshll.u32 %v654_v53, 16  ;;  %v708_v61 = vshrl.u32 %v654_v53, 16  ;;  %v662_v4 = vsel %vm132_vm3, %v661_v52, %v625_v23  ;;  %v1472_v23 = vld [vmem:[%s1686_s5] sm:$0xff]  }
 0x12f   :  { %v635_v2 = vor.u32 %v634_v59, %v630_v54  ;;  %v717_v6 = vrot.slane %v715_v58, 1  ;;  %v692_v8 = vrot.slane %v690_v62, 1  ;;  %v703_v10 = vshll.u32 %v641_v60, 16 }
 0x130   :  { %v674_v63 = vsel %vm132_vm3, %v669_v56, %v673_v43  ;;  %v712_v1 = vrot.slane %v710_v57, 1  ;;  %v688_v13 = vshrl.u32 %v1203_v47, 16 }
 0x131   :  { %956 = vmatprep.mubr.bf16.mxu0 %v674_v63  ;;  %v640_v7 = vsel %vm132_vm3, %v635_v2, %v639_v3  ;;  %v705_v19 = vrot.slane %v703_v10, 1 }
 0x132   :  { %957 = vmatmul.mubr.bf16.vlgmr.msra.gmra.mxu0 %v662_v4  ;;  %v713_v5 = vor.u32 %v712_v1, %v708_v61  ;;  %v698_v9 = vshll.u32 %v640_v7, 16  ;;  %v696_v14 = vshrl.u32 %v640_v7, 16  ;;  %v693_v16 = vor.u32 %v692_v8, %v688_v13 }
 0x133   :  { %1378 = vmatpush3.bf16.msra.mxu0 %v1617_v18  ;;  %v59_v18 = vpack.c.bf16 %v1576_v25, %v1571_v24  ;;  %v1470_v24 = vld [vmem:[%s1686_s5 + $0x10] sm:$0xff]   ;;  %v1471_v25 = vld [vmem:[%s1686_s5 + $0x8] sm:$0xff]  }
 0x134   :  { %1379 = vmatprep.subr.bf16.mxu0 %v1462_v0  ;;  %v718_v11 = vsel %vm132_vm3, %v713_v5, %v717_v6  ;;  %v700_v15 = vrot.slane %v698_v9, 1  ;;  %v694_v21 = vsel %vm132_vm3, %v693_v16, %v639_v3 }
 0x135   :  { %1374 = vmatmul.mubr.bf16.vlgmr.msra.gmra.mxu1 %v718_v11 }
 0x136   :  { %v701_v17 = vor.u32 %v700_v15, %v696_v14 }
 0x137   :  { %1380 = vmatpush3.bf16.msra.mxu0 %v1462_v0 }
 0x138   :  { %1381 = vmatprep.subr.bf16.mxu0 %v1466_v12  ;;  %v706_v32 = vsel %vm132_vm3, %v701_v17, %v705_v19 }
 0x139   :  { %964 = vmatprep.mubr.bf16.mxu0 %v706_v32 }
 0x13a   :  { %965 = vmatmul.mubr.bf16.gmra.mxu0 %v694_v21 }
 0x13b   :  { %1382 = vmatpush3.bf16.msra.mxu0 %v1466_v12  ;;  %1393 = vmatprep.mubr.bf16.mxu0 %v59_v18 }
 0x13c   :  { %1383 = vmatprep.subr.bf16.mxu0 %v1468_v20 }
 0x13f   :  { %1384 = vmatpush3.bf16.msra.mxu0 %v1468_v20 }
 0x140   :  { %1385 = vmatprep.subr.bf16.mxu0 %v1469_v22 }
 0x143   :  { %1386 = vmatpush3.bf16.msra.mxu0 %v1469_v22 }
 0x144   :  { %1387 = vmatprep.subr.bf16.mxu0 %v1470_v24 }
 0x147   :  { %1388 = vmatpush3.bf16.msra.mxu0 %v1470_v24 }
 0x148   :  { %1389 = vmatprep.subr.bf16.mxu0 %v1471_v25 }
 0x14b   :  { %1390 = vmatpush3.bf16.msra.mxu0 %v1471_v25 }
 0x14c   :  { %1391 = vmatprep.subr.bf16.mxu0 %v1472_v23 }
 0x14f   :  { %1392 = vmatpush3.bf16.msra.mxu0 %v1472_v23 }
 0x152   :  { %1394 = vmatmul.mubr.bf16.vlgmr.msra.gmra.mxu0 %v60_v27 }
 0x1f2   :  { %v1305_v28 = vpop.f32.mrf.mxu0 }
 0x1f4   :  { %v1306_v30 = vpop.f32.mrf.mxu0 }
 0x1f5   :  { %v1375_v37 = vpop.f32.mrf.mxu1  ;;  %v1307_v40 = vadd.f32 %v1306_v30, %v1305_v28 }
 0x1f6   :  { %v1308_v31 = vpop.f32.mrf.mxu0 }
 0x1f7   :  { %v1007_v42 = vpop.f32.mrf.mxu1  ;;  %v959_v44 = vadd.f32 %v1307_v40, %v1209_v41 }
 0x1f8   :  { %v1309_v33 = vpop.f32.mrf.mxu0 }
 0x1f9   :  { %v1310_v29 = vadd.f32 %v1309_v33, %v1308_v31  ;;  %v1376_v45 = vpop.f32.mrf.mxu1  ;;  %v1008_v49 = vadd.f32 %v1007_v42, %v959_v44 }
 0x1fa   :  { %v1311_v34 = vpop.f32.mrf.mxu0 }
 0x1fb   :  { %v962_v50 = vadd.f32 %v1310_v29, %v1209_v41  ;;  %v1010_v51 = vpop.f32.mrf.mxu1  ;;  %v1022_v57 = vmax.f32 %v1008_v49, 0.0 }
 0x1fc   :  { %v1312_v35 = vpop.f32.mrf.mxu0 }
 0x1fd   :  { %v1313_v38 = vadd.f32 %v1312_v35, %v1311_v34  ;;  %v1011_v58 = vadd.f32 %v1010_v51, %v962_v50 }
 0x1fe   :  { %v1314_v36 = vpop.f32.mrf.mxu0 }
 0x1ff   :  { %v967_v43 = vadd.f32 %v1313_v38, %v1209_v41  ;;  %v1023_v2 = vmax.f32 %v1011_v58, 0.0 }
 0x200   :  { %v1315_v39 = vpop.f32.mrf.mxu0 }
 0x201   :  { %v1316_v26 = vadd.f32 %v1315_v39, %v1314_v36  ;;  %v1016_v46 = vadd.f32 %v1375_v37, %v967_v43 }
 0x203   :  { %v970_v47 = vadd.f32 %v1316_v26, %v1209_v41  ;;  %v1024_v54 = vmax.f32 %v1016_v46, 0.0 }
 0x205   :  { %v1019_v53 = vadd.f32 %v1376_v45, %v970_v47 }
 0x207   :  { %v1025_v63 = vmax.f32 %v1019_v53, 0.0 }
 0x212   :  { %v1395_v52 = vpop.f32.mrf.mxu0 }
 0x213   :  { %v1140_v55 = vadd.f32 %v1395_v52, %v1234_v48 }
 0x214   :  { %v1131_v56 = vpop.f32.mrf.mxu0 }
 0x215   :  { %v1148_v59 = vadd.f32 %v1140_v55, %v1024_v54  ;;  %v1132_v61 = vadd.f32 %v1234_v48, %v1131_v56 }
 0x216   :  { %v1396_v60 = vpop.f32.mrf.mxu0 }
 0x217   :  { %1152 = vst [vmem:[%s1688_s7 + $0x10] sm:$0xff] %v1148_v59  ;;  %v1146_v62 = vadd.f32 %v1132_v61, %v1022_v57  ;;  %v1143_v0 = vadd.f32 %v1396_v60, %v1234_v48 }
 0x218   :  { %v1134_v1 = vpop.f32.mrf.mxu0 }
 0x219   :  { %1150 = vst [vmem:[%s1688_s7] sm:$0xff] %v1146_v62  ;;  %v1149_v3 = vadd.f32 %v1143_v0, %v1025_v63  ;;  %v1135_v4 = vadd.f32 %v1234_v48, %v1134_v1 }
 0x21b   :  { %1153 = vst [vmem:[%s1688_s7 + $0x18] sm:$0xff] %v1149_v3  ;;  %v1147_v5 = vadd.f32 %v1135_v4, %v1023_v2 }
 0x21d   :  { %1151 = vst [vmem:[%s1688_s7 + $0x8] sm:$0xff] %v1147_v5 }
 0x21e   :  { %1158 = vsyncpa [#allocation5], 1 }
 0x21f   :  { %1159 = vsyncpa [#allocation7], 1 }

</bundles_post_ra>
